<compile_context>
chip_gen: v6e
topology: v6e:2x2x1
jax: 0.10.0
libtpu: 0.0.40
codegen_flags: <defaults>
</compile_context>

<pallas_src>
import jax
import jax.numpy as jnp
from jax.experimental import pallas as pl
from jax.experimental.pallas import tpu as pltpu

LEAKY_SLOPE = 0.2
BN_EPS = 1e-5
LANE = 128
SUBLANE_BF16 = 16          # bf16 packs 2 rows per sublane -> keep batch tiles %16
MAX_TILE_B = 256           # per-step batch tile cap (keeps VMEM use modest)


def _round_up(n, m):
    return ((n + m - 1) // m) * m


def generator_kernel(x_ref, w1_ref, a1_ref, c1_ref,
                     w2_ref, a2_ref, c2_ref,
                     w3_ref, b3_ref, o_ref):
    """One batch tile of the eval-mode Generator forward.

    Weights are bf16 (native MXU path); dots accumulate in f32
    (preferred_element_type); BN scale/shift, LeakyReLU and the final bias
    are applied in f32 on the VPU.
    """
    # Layer 1: Linear + folded BatchNorm1d + LeakyReLU(0.2)
    z1 = jnp.dot(x_ref[...], w1_ref[...], preferred_element_type=jnp.float32)
    h1 = z1 * a1_ref[...] + c1_ref[...]
    h1 = jnp.maximum(h1, LEAKY_SLOPE * h1)          # LeakyReLU, slope < 1
    # TODO(synk): training-mode GaussianNoiseLayer (mean=0, std=0.2) would use
    # pltpu.prng_seed + pltpu.stateful_normal; eval mode is the identity.

    # Layer 2: Linear + folded BatchNorm1d + LeakyReLU(0.2)
    z2 = jnp.dot(h1.astype(w2_ref.dtype), w2_ref[...],
                 preferred_element_type=jnp.float32)
    h2 = z2 * a2_ref[...] + c2_ref[...]
    h2 = jnp.maximum(h2, LEAKY_SLOPE * h2)

    # Layer 3: plain Linear (bias added in f32)
    z3 = jnp.dot(h2.astype(w3_ref.dtype), w3_ref[...],
                 preferred_element_type=jnp.float32)
    o_ref[...] = (z3 + b3_ref[...]).astype(o_ref.dtype)


def init_raw_params(key, in_dim, hid_dim, out_dim):
    """nn.Linear-style init (uniform +-1/sqrt(fan_in)) + eval-mode BN stats."""
    ks = jax.random.split(key, 14)

    def linear(kw, kb, fan_in, fan_out):
        lim = 1.0 / jnp.sqrt(jnp.asarray(fan_in, jnp.float32))
        w = jax.random.uniform(kw, (fan_in, fan_out), jnp.float32, -lim, lim)
        b = jax.random.uniform(kb, (fan_out,), jnp.float32, -lim, lim)
        return w, b

    w1, b1 = linear(ks[0], ks[1], in_dim, hid_dim)
    w2, b2 = linear(ks[2], ks[3], hid_dim, hid_dim)
    w3, b3 = linear(ks[4], ks[5], hid_dim, out_dim)

    def bn(kg, kb_, km, kv, n):
        gamma = jax.random.uniform(kg, (n,), jnp.float32, 0.8, 1.2)
        beta = jax.random.normal(kb_, (n,), jnp.float32) * 0.1
        mean = jax.random.normal(km, (n,), jnp.float32) * 0.1
        var = jax.random.uniform(kv, (n,), jnp.float32, 0.5, 1.5)
        return gamma, beta, mean, var

    g1, be1, m1, v1 = bn(ks[6], ks[7], ks[8], ks[9], hid_dim)
    g2, be2, m2, v2 = bn(ks[10], ks[11], ks[12], ks[13], hid_dim)

    return dict(w1=w1, b1=b1, g1=g1, be1=be1, m1=m1, v1=v1,
                w2=w2, b2=b2, g2=g2, be2=be2, m2=m2, v2=v2,
                w3=w3, b3=b3)


def _fold_bn(bias, gamma, beta, mean, var):
    # BN(x@W + b) = (x@W) * a + c   with   a = gamma/sqrt(var+eps),
    #                                      c = (b - mean) * a + beta
    a = gamma / jnp.sqrt(var + BN_EPS)
    c = (bias - mean) * a + beta
    return a.astype(jnp.float32), c.astype(jnp.float32)


def prepare_params(raw):
    """Fold BN, pad feature dims to multiples of 128, cast weights to bf16."""
    in_dim, hid_dim = raw["w1"].shape
    out_dim = raw["w3"].shape[1]
    in_p = _round_up(in_dim, LANE)
    hid_p = _round_up(hid_dim, LANE)
    out_p = _round_up(out_dim, LANE)

    a1, c1 = _fold_bn(raw["b1"], raw["g1"], raw["be1"], raw["m1"], raw["v1"])
    a2, c2 = _fold_bn(raw["b2"], raw["g2"], raw["be2"], raw["m2"], raw["v2"])

    def pad2(w, r, c_):
        return jnp.pad(w, ((0, r - w.shape[0]), (0, c_ - w.shape[1])))

    def pad_row(v, n):
        return jnp.pad(v, (0, n - v.shape[0])).reshape(1, n).astype(jnp.float32)

    return dict(
        w1=pad2(raw["w1"], in_p, hid_p).astype(jnp.bfloat16),
        a1=pad_row(a1, hid_p), c1=pad_row(c1, hid_p),
        w2=pad2(raw["w2"], hid_p, hid_p).astype(jnp.bfloat16),
        a2=pad_row(a2, hid_p), c2=pad_row(c2, hid_p),
        w3=pad2(raw["w3"], hid_p, out_p).astype(jnp.bfloat16),
        b3=pad_row(raw["b3"], out_p),
        dims=(in_dim, hid_dim, out_dim, in_p, hid_p, out_p),
    )


def generator_forward(x, params, tile_b=None):
    in_dim, hid_dim, out_dim, in_p, hid_p, out_p = params["dims"]
    B = x.shape[0]
    assert x.shape[1] == in_dim

    # Batch tile: biggest that makes sense (fewer grid steps -> less per-step
    # overhead), multiple of 16 for bf16 sublane packing, capped for VMEM.
    if tile_b is None:
        tile_b = min(_round_up(B, SUBLANE_BF16), MAX_TILE_B)
    tile_b = _round_up(tile_b, SUBLANE_BF16)
    B_p = _round_up(max(B, tile_b), tile_b)
    grid_b = B_p // tile_b

    # Zero-pad batch rows / input lanes; cast activations to bf16 for the MXU.
    x_p = jnp.pad(x.astype(jnp.bfloat16),
                  ((0, B_p - B), (0, in_p - in_dim)))

    flops = 2 * B_p * (in_p * hid_p + hid_p * hid_p + hid_p * out_p)
    bytes_accessed = (
        x_p.size * 2
        + (params["w1"].size + params["w2"].size + params["w3"].size) * 2
        + (4 * hid_p + out_p) * 4
        + B_p * out_p * 4)

    # Only shard the batch axis across cores when there is enough work to pay
    # for the duplicated weight fetch (v7x megacore); otherwise keep it serial
    # so the resident weights are DMA'd exactly once.
    semantics = ("parallel",) if grid_b >= 4 else ("arbitrary",)

    out = pl.pallas_call(
        generator_kernel,
        out_shape=jax.ShapeDtypeStruct((B_p, out_p), jnp.float32),
        grid_spec=pltpu.PrefetchScalarGridSpec(
            num_scalar_prefetch=0,
            grid=(grid_b,),
            in_specs=[
                pl.BlockSpec((tile_b, in_p), lambda i: (i, 0)),   # x: tiled over batch
                pl.BlockSpec((in_p, hid_p), lambda i: (0, 0)),    # w1: resident
                pl.BlockSpec((1, hid_p), lambda i: (0, 0)),       # a1
                pl.BlockSpec((1, hid_p), lambda i: (0, 0)),       # c1
                pl.BlockSpec((hid_p, hid_p), lambda i: (0, 0)),   # w2: resident
                pl.BlockSpec((1, hid_p), lambda i: (0, 0)),       # a2
                pl.BlockSpec((1, hid_p), lambda i: (0, 0)),       # c2
                pl.BlockSpec((hid_p, out_p), lambda i: (0, 0)),   # w3: resident
                pl.BlockSpec((1, out_p), lambda i: (0, 0)),       # b3
            ],
            out_specs=pl.BlockSpec((tile_b, out_p), lambda i: (i, 0)),
        ),
        compiler_params=pltpu.CompilerParams(
            dimension_semantics=semantics,
            vmem_limit_bytes=64 * 1024 * 1024,
        ),
        cost_estimate=pl.CostEstimate(
            flops=flops, transcendentals=0, bytes_accessed=bytes_accessed),
    )(x_p, params["w1"], params["a1"], params["c1"],
      params["w2"], params["a2"], params["c2"],
      params["w3"], params["b3"])

    return out[:B, :out_dim]


def reference_forward(x, raw):
    """Plain-JAX reference with the same bf16 weight cast / f32 accumulation."""
    a1, c1 = _fold_bn(raw["b1"], raw["g1"], raw["be1"], raw["m1"], raw["v1"])
    a2, c2 = _fold_bn(raw["b2"], raw["g2"], raw["be2"], raw["m2"], raw["v2"])

    def leaky(h):
        return jnp.where(h > 0, h, LEAKY_SLOPE * h)

    h = jnp.dot(x.astype(jnp.bfloat16), raw["w1"].astype(jnp.bfloat16),
                preferred_element_type=jnp.float32)
    h = leaky(h * a1 + c1)
    h = jnp.dot(h.astype(jnp.bfloat16), raw["w2"].astype(jnp.bfloat16),
                preferred_element_type=jnp.float32)
    h = leaky(h * a2 + c2)
    y = jnp.dot(h.astype(jnp.bfloat16), raw["w3"].astype(jnp.bfloat16),
                preferred_element_type=jnp.float32)
    return y + raw["b3"]


if __name__ == "__main__":
    key = jax.random.PRNGKey(0)
    kx, kp = jax.random.split(key)

    # Small shapes consistent with the module: hid_dim = (in_dim + out_dim) / 2.
    # Chosen as multiples of 128 so all lane dims are unmasked.
    B, in_dim, out_dim = 32, 384, 128
    hid_dim = (in_dim + out_dim) // 2  # 256

    x = jax.random.normal(kx, (B, in_dim), jnp.float32)
    raw = init_raw_params(kp, in_dim, hid_dim, out_dim)
    params = prepare_params(raw)

    y = generator_forward(x, params)
    y = jax.block_until_ready(y)
    assert y.shape == (B, out_dim)

    y_ref = reference_forward(x, raw)
    assert jnp.allclose(y, y_ref, atol=1e-3, rtol=1e-3), (
        float(jnp.max(jnp.abs(y - y_ref))))

    # Also exercise a multi-step grid (batch tiling path).
    y2 = generator_forward(x, params, tile_b=16)
    y2 = jax.block_until_ready(y2)
    assert jnp.allclose(y2, y_ref, atol=1e-3, rtol=1e-3)

    print("KERNEL_OK")
</pallas_src>

<mosaic_0001>
module attributes {stable_mosaic.version = 11 : i64} {
  func.func @generator_kernel(%arg0: i32, %arg1: memref<32x384xbf16, #tpu.memory_space<vmem>>, %arg2: memref<384x256xbf16, #tpu.memory_space<vmem>>, %arg3: memref<1x256xf32, #tpu.memory_space<vmem>>, %arg4: memref<1x256xf32, #tpu.memory_space<vmem>>, %arg5: memref<256x256xbf16, #tpu.memory_space<vmem>>, %arg6: memref<1x256xf32, #tpu.memory_space<vmem>>, %arg7: memref<1x256xf32, #tpu.memory_space<vmem>>, %arg8: memref<256x128xbf16, #tpu.memory_space<vmem>>, %arg9: memref<1x128xf32, #tpu.memory_space<vmem>>, %arg10: memref<32x128xf32, #tpu.memory_space<vmem>>) attributes {dimension_semantics = [#tpu.dimension_semantics<arbitrary>], iteration_bounds = array<i64: 1>, scalar_prefetch = 0 : i64, scratch_operands = 0 : i64, tpu.core_type = #tpu.core_type<tc>, window_params = [{transform_indices = @transform_0, window_bounds = array<i64: 32, 384>}, {pipeline_mode = #tpu.pipeline_mode<synchronous>, transform_indices = @transform_1, window_bounds = array<i64: 384, 256>}, {pipeline_mode = #tpu.pipeline_mode<synchronous>, transform_indices = @transform_2, window_bounds = array<i64: 1, 256>}, {pipeline_mode = #tpu.pipeline_mode<synchronous>, transform_indices = @transform_3, window_bounds = array<i64: 1, 256>}, {pipeline_mode = #tpu.pipeline_mode<synchronous>, transform_indices = @transform_4, window_bounds = array<i64: 256, 256>}, {pipeline_mode = #tpu.pipeline_mode<synchronous>, transform_indices = @transform_5, window_bounds = array<i64: 1, 256>}, {pipeline_mode = #tpu.pipeline_mode<synchronous>, transform_indices = @transform_6, window_bounds = array<i64: 1, 256>}, {pipeline_mode = #tpu.pipeline_mode<synchronous>, transform_indices = @transform_7, window_bounds = array<i64: 256, 128>}, {pipeline_mode = #tpu.pipeline_mode<synchronous>, transform_indices = @transform_8, window_bounds = array<i64: 1, 128>}, {transform_indices = @transform_9, window_bounds = array<i64: 32, 128>}]} {
    %c0 = arith.constant 0 : index
    %c0_0 = arith.constant 0 : index
    %0 = vector.load %arg1[%c0, %c0_0] : memref<32x384xbf16, #tpu.memory_space<vmem>>, vector<32x384xbf16>
    %c0_1 = arith.constant 0 : index
    %c0_2 = arith.constant 0 : index
    %1 = vector.load %arg2[%c0_1, %c0_2] : memref<384x256xbf16, #tpu.memory_space<vmem>>, vector<384x256xbf16>
    %cst = arith.constant dense<0.000000e+00> : vector<32x256xf32>
    %2 = tpu.matmul %0, %1, %cst {dimension_numbers = #tpu.dot_dimension_numbers<[1], [0], [0], [1], [0, 0, 1, 1], [], []>} : vector<32x384xbf16>, vector<384x256xbf16>, vector<32x256xf32> -> vector<32x256xf32>
    %c0_3 = arith.constant 0 : index
    %c0_4 = arith.constant 0 : index
    %3 = vector.load %arg3[%c0_3, %c0_4] : memref<1x256xf32, #tpu.memory_space<vmem>>, vector<1x256xf32>
    %4 = vector.broadcast %3 : vector<1x256xf32> to vector<32x256xf32>
    %5 = arith.mulf %2, %4 : vector<32x256xf32>
    %c0_5 = arith.constant 0 : index
    %c0_6 = arith.constant 0 : index
    %6 = vector.load %arg4[%c0_5, %c0_6] : memref<1x256xf32, #tpu.memory_space<vmem>>, vector<1x256xf32>
    %7 = vector.broadcast %6 : vector<1x256xf32> to vector<32x256xf32>
    %8 = arith.addf %5, %7 : vector<32x256xf32>
    %cst_7 = arith.constant 2.000000e-01 : f32
    %9 = vector.broadcast %cst_7 : f32 to vector<32x256xf32>
    %10 = arith.mulf %9, %8 : vector<32x256xf32>
    %11 = arith.maximumf %8, %10 : vector<32x256xf32>
    %12 = arith.truncf %11 : vector<32x256xf32> to vector<32x256xbf16>
    %c0_8 = arith.constant 0 : index
    %c0_9 = arith.constant 0 : index
    %13 = vector.load %arg5[%c0_8, %c0_9] : memref<256x256xbf16, #tpu.memory_space<vmem>>, vector<256x256xbf16>
    %cst_10 = arith.constant dense<0.000000e+00> : vector<32x256xf32>
    %14 = tpu.matmul %12, %13, %cst_10 {dimension_numbers = #tpu.dot_dimension_numbers<[1], [0], [0], [1], [0, 0, 1, 1], [], []>} : vector<32x256xbf16>, vector<256x256xbf16>, vector<32x256xf32> -> vector<32x256xf32>
    %c0_11 = arith.constant 0 : index
    %c0_12 = arith.constant 0 : index
    %15 = vector.load %arg6[%c0_11, %c0_12] : memref<1x256xf32, #tpu.memory_space<vmem>>, vector<1x256xf32>
    %16 = vector.broadcast %15 : vector<1x256xf32> to vector<32x256xf32>
    %17 = arith.mulf %14, %16 : vector<32x256xf32>
    %c0_13 = arith.constant 0 : index
    %c0_14 = arith.constant 0 : index
    %18 = vector.load %arg7[%c0_13, %c0_14] : memref<1x256xf32, #tpu.memory_space<vmem>>, vector<1x256xf32>
    %19 = vector.broadcast %18 : vector<1x256xf32> to vector<32x256xf32>
    %20 = arith.addf %17, %19 : vector<32x256xf32>
    %cst_15 = arith.constant 2.000000e-01 : f32
    %21 = vector.broadcast %cst_15 : f32 to vector<32x256xf32>
    %22 = arith.mulf %21, %20 : vector<32x256xf32>
    %23 = arith.maximumf %20, %22 : vector<32x256xf32>
    %24 = arith.truncf %23 : vector<32x256xf32> to vector<32x256xbf16>
    %c0_16 = arith.constant 0 : index
    %c0_17 = arith.constant 0 : index
    %25 = vector.load %arg8[%c0_16, %c0_17] : memref<256x128xbf16, #tpu.memory_space<vmem>>, vector<256x128xbf16>
    %cst_18 = arith.constant dense<0.000000e+00> : vector<32x128xf32>
    %26 = tpu.matmul %24, %25, %cst_18 {dimension_numbers = #tpu.dot_dimension_numbers<[1], [0], [0], [1], [0, 0, 1, 1], [], []>} : vector<32x256xbf16>, vector<256x128xbf16>, vector<32x128xf32> -> vector<32x128xf32>
    %c0_19 = arith.constant 0 : index
    %c0_20 = arith.constant 0 : index
    %27 = vector.load %arg9[%c0_19, %c0_20] : memref<1x128xf32, #tpu.memory_space<vmem>>, vector<1x128xf32>
    %28 = vector.broadcast %27 : vector<1x128xf32> to vector<32x128xf32>
    %29 = arith.addf %26, %28 : vector<32x128xf32>
    %c0_21 = arith.constant 0 : index
    %c0_22 = arith.constant 0 : index
    %30 = vector.load %arg10[%c0_21, %c0_22] : memref<32x128xf32, #tpu.memory_space<vmem>>, vector<32x128xf32>
    tpu.vector_store %arg10[%c0_21, %c0_22], %29 {strides = array<i32>} : memref<32x128xf32, #tpu.memory_space<vmem>>, vector<32x128xf32>,
    return
  }
  func.func @transform_0(%arg0: i32) -> (i32, i32) {
    %c0_i32 = arith.constant 0 : i32
    %c0_i32_0 = arith.constant 0 : i32
    return %arg0, %c0_i32 : i32, i32
  }
  func.func @transform_1(%arg0: i32) -> (i32, i32) {
    %c0_i32 = arith.constant 0 : i32
    %c0_i32_0 = arith.constant 0 : i32
    %c0_i32_1 = arith.constant 0 : i32
    return %c0_i32, %c0_i32_0 : i32, i32
  }
  func.func @transform_2(%arg0: i32) -> (i32, i32) {
    %c0_i32 = arith.constant 0 : i32
    %c0_i32_0 = arith.constant 0 : i32
    %c0_i32_1 = arith.constant 0 : i32
    return %c0_i32, %c0_i32_0 : i32, i32
  }
  func.func @transform_3(%arg0: i32) -> (i32, i32) {
    %c0_i32 = arith.constant 0 : i32
    %c0_i32_0 = arith.constant 0 : i32
    %c0_i32_1 = arith.constant 0 : i32
    return %c0_i32, %c0_i32_0 : i32, i32
  }
  func.func @transform_4(%arg0: i32) -> (i32, i32) {
    %c0_i32 = arith.constant 0 : i32
    %c0_i32_0 = arith.constant 0 : i32
    %c0_i32_1 = arith.constant 0 : i32
    return %c0_i32, %c0_i32_0 : i32, i32
  }
  func.func @transform_5(%arg0: i32) -> (i32, i32) {
    %c0_i32 = arith.constant 0 : i32
    %c0_i32_0 = arith.constant 0 : i32
    %c0_i32_1 = arith.constant 0 : i32
    return %c0_i32, %c0_i32_0 : i32, i32
  }
  func.func @transform_6(%arg0: i32) -> (i32, i32) {
    %c0_i32 = arith.constant 0 : i32
    %c0_i32_0 = arith.constant 0 : i32
    %c0_i32_1 = arith.constant 0 : i32
    return %c0_i32, %c0_i32_0 : i32, i32
  }
  func.func @transform_7(%arg0: i32) -> (i32, i32) {
    %c0_i32 = arith.constant 0 : i32
    %c0_i32_0 = arith.constant 0 : i32
    %c0_i32_1 = arith.constant 0 : i32
    return %c0_i32, %c0_i32_0 : i32, i32
  }
  func.func @transform_8(%arg0: i32) -> (i32, i32) {
    %c0_i32 = arith.constant 0 : i32
    %c0_i32_0 = arith.constant 0 : i32
    %c0_i32_1 = arith.constant 0 : i32
    return %c0_i32, %c0_i32_0 : i32, i32
  }
  func.func @transform_9(%arg0: i32) -> (i32, i32) {
    %c0_i32 = arith.constant 0 : i32
    %c0_i32_0 = arith.constant 0 : i32
    return %arg0, %c0_i32 : i32, i32
  }
}

</mosaic_0001>

<bundles_post_ra>
// kernel: tpu_custom_call.1
= control target key start
LH: loop header
LB: loop body
LE: loop exit
PB: predicated region body
PF: predicated region fallthrough
CT: control target
= control target key end

     0   :  { %14 = vsyncpa [#allocation3], 0  ;;  %s1605_s0 = inlined_call_operand.hbm [shape: bf16[32,384], index: 0, kind: input, shape index: {}]   ;;  %s1606_s1 = inlined_call_operand.hbm [shape: bf16[384,256], index: 1, kind: input, shape index: {}]   ;;  %s1607_s2 = inlined_call_operand.vmem [shape: f32[1,256], index: 2, kind: input, shape index: {}]   ;;  %s1608_s3 = inlined_call_operand.vmem [shape: f32[1,256], index: 3, kind: input, shape index: {}]   ;;  %s1609_s4 = inlined_call_operand.hbm [shape: bf16[256,256], index: 4, kind: input, shape index: {}]   ;;  %s1610_s5 = inlined_call_operand.vmem [shape: f32[1,256], index: 5, kind: input, shape index: {}]   ;;  %s1611_s6 = inlined_call_operand.vmem [shape: f32[1,256], index: 6, kind: input, shape index: {}]   ;;  %s1612_s7 = inlined_call_operand.hbm [shape: bf16[256,128], index: 7, kind: input, shape index: {}]   ;;  %s1613_s8 = inlined_call_operand.vmem [shape: f32[1,128], index: 8, kind: input, shape index: {}]   ;;  %s1614_s9 = inlined_call_operand.hbm [shape: f32[32,128], index: 9, kind: output, shape index: {}]  }
   0x1   :  { %15 = vsyncpa [#allocation6], 0 }
   0x2   :  { %16 = vsyncpa [#allocation9], 0 }
   0x3   :  { %17 = vsyncpa [#allocation4], 0  ;;  %s1490_s30 = smov [#allocation5]  }
   0x4   :  { %s35_s10 = sshll.u32 %s1490_s30, 4  ;;  %s36_s10 = int_to_ptr.vmem [resolvable:$true] %s35_s10 }
   0x5   :  { %s1390_s11 = scalar_lea.vmem %s36_s10, 6144  ;;  %p1395_p1 = scmp.lt.s32.totalorder %s36_s10, %s36_s10 }
   0x6   :  { %p1391_p0 = scmp.ne.s32.totalorder %s36_s10, %s1390_s11  ;;  %p1396_p2 = scmp.lt.s32.totalorder %s1390_s11, %s1390_s11 }
   0x8   :  { %p1397_p3 = por %p1396_p2, %p1395_p1 }
   0xa   :  { %p1398_p4 = pnand %p1397_p3, %p1391_p0 }
   0xc   :  { %1401 = shalt.err (!%p1398_p4)
}
   0xd   :  { %s1491_s12 = smov 128   ;;  %s1492_s13 = smov 8  }
   0xe   :  { %41 = dma.hbm_to_vmem [thread:$0]  %s1606_s1, 6144, %s36_s10, [#allocation6], %s1491_s12, %s1491_s12, %s1492_s13  }
   0xf   :  { %s1493_s16 = smov [#allocation2]  }
  0x10   :  { %s23_s17 = sshll.u32 %s1493_s16, 4  ;;  %s24_s17 = int_to_ptr.vmem [resolvable:$true] %s23_s17 }
  0x11   :  { %s1410_s18 = scalar_lea.vmem %s24_s17, 768  ;;  %p1415_p6 = scmp.lt.s32.totalorder %s24_s17, %s24_s17 }
  0x12   :  { %p1411_p5 = scmp.ne.s32.totalorder %s24_s17, %s1410_s18  ;;  %p1416_p7 = scmp.lt.s32.totalorder %s1410_s18, %s1410_s18 }
  0x14   :  { %p1417_p8 = por %p1416_p7, %p1415_p6 }
  0x16   :  { %p1418_p9 = pnand %p1417_p8, %p1411_p5 }
  0x18   :  { %1421 = shalt.err (!%p1418_p9)
}
  0x19   :  { %s1494_s19 = smov 192   ;;  %s1495_s20 = smov 12  }
  0x1a   :  { %29 = dma.hbm_to_vmem [thread:$0]  %s1605_s0, 768, %s24_s17, [#allocation3], %s1494_s19, %s1494_s19, %s1495_s20  }
  0x1b   :  { %s1496_s23 = smov [#allocation7]   ;;  %s1497_s25 = smov [#allocation8]  }
  0x1c   :  { %s51_s24 = sshll.u32 %s1496_s23, 4  ;;  %s67_s1 = sshll.u32 %s1497_s25, 4  ;;  %s52_s24 = int_to_ptr.vmem [resolvable:$true] %s51_s24  ;;  %s68_s1 = int_to_ptr.vmem [resolvable:$true] %s67_s1 }
  0x1d   :  { %s1430_s26 = scalar_lea.vmem %s52_s24, 4096  ;;  %p1435_p11 = scmp.lt.s32.totalorder %s52_s24, %s52_s24 }
  0x1e   :  { %p1431_p10 = scmp.ne.s32.totalorder %s52_s24, %s1430_s26  ;;  %p1436_p12 = scmp.lt.s32.totalorder %s1430_s26, %s1430_s26 }
  0x20   :  { %p1437_p13 = por %p1436_p12, %p1435_p11 }
  0x22   :  { %p1438_p0 = pnand %p1437_p13, %p1431_p10 }
  0x24   :  { %1441 = shalt.err (!%p1438_p0)
}
  0x25   :  { %57 = dma.hbm_to_vmem [thread:$0]  %s1609_s4, 4096, %s52_s24, [#allocation6], %s1491_s12, %s1491_s12, %s1492_s13  }
  0x26   :  { %s1450_s0 = scalar_lea.vmem %s68_s1, 2048  ;;  %p1455_p2 = scmp.lt.s32.totalorder %s68_s1, %s68_s1 }
  0x27   :  { %p1451_p1 = scmp.ne.s32.totalorder %s68_s1, %s1450_s0  ;;  %p1456_p3 = scmp.lt.s32.totalorder %s1450_s0, %s1450_s0 }
  0x29   :  { %p1457_p4 = por %p1456_p3, %p1455_p2 }
  0x2b   :  { %p1458_p5 = pnand %p1457_p4, %p1451_p1 }
  0x2d   :  { %1461 = shalt.err (!%p1458_p5)
}
  0x2e   :  { %s1498_s29 = smov 64   ;;  %s1499_s30 = smov 4  }
  0x2f   :  { %73 = dma.hbm_to_vmem [thread:$0]  %s1612_s7, 2048, %s68_s1, [#allocation9], %s1498_s29, %s1498_s29, %s1499_s30  }
  0x30   :  { %1482 = dma.done.wait [#allocation3], 768  }
  0x31   :  { %1483 = vsyncadd [#allocation3], 4294966528 }
  0x32   :  { %1484 = dma.done.wait [#allocation6], 10240  }
  0x33   :  { %1485 = vsyncadd [#allocation6], 4294957056 }
  0x34   :  { %1486 = dma.done.wait [#allocation9], 2048  }
  0x35   :  { %1487 = vsyncadd [#allocation9], 4294965248  ;;  %v1500_v0 = vmov 0   ;;  %v1238_v1 = vld [vmem:[#allocation5 + $0x74] ss:$8 sps:$4 sm:$0xff]   ;;  %s1501_s18 = smov [#allocation10]  }
  0x36   :  { %502 = vmatprep.mubr.bf16.mxu1 %v1500_v0  ;;  %v1240_v2 = vld [vmem:[#allocation5 + $0x70] ss:$8 sps:$4 sm:$0xff]   ;;  %417 = vmatprep.subr.bf16.mxu0 %v1238_v1  ;;  %v1241_v3 = vld [vmem:[#allocation5 + $0x64] ss:$8 sps:$4 sm:$0xff]   ;;  %v1243_v4 = vld [vmem:[#allocation5 + $0x60] ss:$8 sps:$4 sm:$0xff]  }
  0x37   :  { %418 = vmatpush1.bf16.msra.mxu0 %v1240_v2  ;;  %v1244_v5 = vld [vmem:[#allocation5 + $0x54] ss:$8 sps:$4 sm:$0xff]   ;;  %v1246_v6 = vld [vmem:[#allocation5 + $0x50] ss:$8 sps:$4 sm:$0xff]   ;;  %v1247_v7 = vld [vmem:[#allocation5 + $0x44] ss:$8 sps:$4 sm:$0xff]  }
  0x38   :  { %419 = vmatprep.subr.bf16.mxu0 %v1241_v3  ;;  %v1259_v8 = vld [vmem:[#allocation5 + $0x174] ss:$8 sps:$4 sm:$0xff]   ;;  %v1261_v9 = vld [vmem:[#allocation5 + $0x170] ss:$8 sps:$4 sm:$0xff]   ;;  %v1249_v10 = vld [vmem:[#allocation5 + $0x40] ss:$8 sps:$4 sm:$0xff]  }
  0x39   :  { %v1250_v11 = vld [vmem:[#allocation5 + $0x34] ss:$8 sps:$4 sm:$0xff]   ;;  %470 = vmatprep.subr.bf16.mxu1 %v1259_v8  ;;  %v1265_v12 = vld [vmem:[#allocation5 + $0x164] ss:$8 sps:$4 sm:$0xff]   ;;  %v1267_v13 = vld [vmem:[#allocation5 + $0x160] ss:$8 sps:$4 sm:$0xff]  }
  0x3a   :  { %471 = vmatpush1.bf16.msra.mxu1 %v1261_v9  ;;  %v1252_v14 = vld [vmem:[#allocation5 + $0x30] ss:$8 sps:$4 sm:$0xff]   ;;  %v1271_v15 = vld [vmem:[#allocation5 + $0x154] ss:$8 sps:$4 sm:$0xff]   ;;  %v1253_v16 = vld [vmem:[#allocation5 + $0x24] ss:$8 sps:$4 sm:$0xff]  }
  0x3b   :  { %420 = vmatpush1.bf16.msra.mxu0 %v1243_v4  ;;  %472 = vmatprep.subr.bf16.mxu1 %v1265_v12  ;;  %v1273_v17 = vld [vmem:[#allocation5 + $0x150] ss:$8 sps:$4 sm:$0xff]   ;;  %v1277_v18 = vld [vmem:[#allocation5 + $0x144] ss:$8 sps:$4 sm:$0xff]   ;;  %v1255_v19 = vld [vmem:[#allocation5 + $0x20] ss:$8 sps:$4 sm:$0xff]  }
  0x3c   :  { %421 = vmatprep.subr.bf16.mxu0 %v1244_v5  ;;  %v1256_v20 = vld [vmem:[#allocation5 + $0x14] ss:$8 sps:$4 sm:$0xff]   ;;  %v1279_v21 = vld [vmem:[#allocation5 + $0x140] ss:$8 sps:$4 sm:$0xff]   ;;  %v1258_v23 = vld [vmem:[#allocation5 + $0x10] ss:$8 sps:$4 sm:$0xff]  }
  0x3d   :  { %v1283_v22 = vld [vmem:[#allocation5 + $0x134] ss:$8 sps:$4 sm:$0xff]   ;;  %v1262_v24 = vld [vmem:[#allocation5 + $0x4] ss:$8 sps:$4 sm:$0xff]   ;;  %v1285_v25 = vld [vmem:[#allocation5 + $0x130] ss:$8 sps:$4 sm:$0xff]  }
  0x3e   :  { %473 = vmatpush1.bf16.msra.mxu1 %v1267_v13  ;;  %v1289_v26 = vld [vmem:[#allocation5 + $0x124] ss:$8 sps:$4 sm:$0xff]   ;;  %v1264_v27 = vld [vmem:[#allocation5] ss:$8 sps:$4 sm:$0xff]   ;;  %v1268_v28 = vld [vmem:[#allocation5 + $0xf4] ss:$8 sps:$4 sm:$0xff]  }
  0x3f   :  { %422 = vmatpush1.bf16.msra.mxu0 %v1246_v6  ;;  %474 = vmatprep.subr.bf16.mxu1 %v1271_v15  ;;  %v1291_v29 = vld [vmem:[#allocation5 + $0x120] ss:$8 sps:$4 sm:$0xff]   ;;  %v1295_v30 = vld [vmem:[#allocation5 + $0x114] ss:$8 sps:$4 sm:$0xff]   ;;  %v1270_v31 = vld [vmem:[#allocation5 + $0xf0] ss:$8 sps:$4 sm:$0xff]  }
  0x40   :  { %423 = vmatprep.subr.bf16.mxu0 %v1247_v7  ;;  %v1274_v32 = vld [vmem:[#allocation5 + $0xe4] ss:$8 sps:$4 sm:$0xff]   ;;  %v1297_v33 = vld [vmem:[#allocation5 + $0x110] ss:$8 sps:$4 sm:$0xff]   ;;  %v1313_v35 = vld [vmem:[#allocation2 + $0x4] ss:$12 sps:$4 sm:$0xff]  }
  0x41   :  { %v1301_v34 = vld [vmem:[#allocation5 + $0x104] ss:$8 sps:$4 sm:$0xff]   ;;  %v1276_v36 = vld [vmem:[#allocation5 + $0xe0] ss:$8 sps:$4 sm:$0xff]   ;;  %v1280_v37 = vld [vmem:[#allocation5 + $0xd4] ss:$8 sps:$4 sm:$0xff]   ;;  %449 = vmatprep.mubr.bf16.mxu0 %v1313_v35 }
  0x42   :  { %475 = vmatpush1.bf16.msra.mxu1 %v1273_v17  ;;  %v1303_v38 = vld [vmem:[#allocation5 + $0x100] ss:$8 sps:$4 sm:$0xff]   ;;  %v1320_v39 = vld [vmem:[#allocation7 + $0x74] ss:$8 sps:$4 sm:$0xff]   ;;  %v1282_v40 = vld [vmem:[#allocation5 + $0xd0] ss:$8 sps:$4 sm:$0xff]  }
  0x43   :  { %424 = vmatpush1.bf16.msra.mxu0 %v1249_v10  ;;  %476 = vmatprep.subr.bf16.mxu1 %v1277_v18  ;;  %v1286_v41 = vld [vmem:[#allocation5 + $0xc4] ss:$8 sps:$4 sm:$0xff]   ;;  %v1318_v43 = vld [vmem:[#allocation7 + $0x70] ss:$8 sps:$4 sm:$0xff]   ;;  %v1288_v45 = vld [vmem:[#allocation5 + $0xc0] ss:$8 sps:$4 sm:$0xff]  }
  0x44   :  { %425 = vmatprep.subr.bf16.mxu0 %v1250_v11  ;;  %v1307_v42 = vld [vmem:[#allocation2 + $0x8] ss:$12 sps:$4 sm:$0xff]   ;;  %v1292_v46 = vld [vmem:[#allocation5 + $0xb4] ss:$8 sps:$4 sm:$0xff]   ;;  %v1321_v47 = vld [vmem:[#allocation7 + $0x60] ss:$8 sps:$4 sm:$0xff]  }
  0x45   :  { %v1323_v44 = vld [vmem:[#allocation7 + $0x64] ss:$8 sps:$4 sm:$0xff]   ;;  %v1326_v48 = vld [vmem:[#allocation7 + $0x54] ss:$8 sps:$4 sm:$0xff]   ;;  %v1294_v49 = vld [vmem:[#allocation5 + $0xb0] ss:$8 sps:$4 sm:$0xff]  }
  0x46   :  { %477 = vmatpush1.bf16.msra.mxu1 %v1279_v21  ;;  %v1298_v50 = vld [vmem:[#allocation5 + $0xa4] ss:$8 sps:$4 sm:$0xff]   ;;  %v1314_v51 = vld [vmem:[#allocation2 + $0x20] ss:$12 sps:$4 sm:$0xff]   ;;  %v1300_v52 = vld [vmem:[#allocation5 + $0xa0] ss:$8 sps:$4 sm:$0xff]  }
  0x47   :  { %426 = vmatpush1.bf16.msra.mxu0 %v1252_v14  ;;  %478 = vmatprep.subr.bf16.mxu1 %v1283_v22  ;;  %v1324_v53 = vld [vmem:[#allocation7 + $0x50] ss:$8 sps:$4 sm:$0xff]   ;;  %v1329_v54 = vld [vmem:[#allocation7 + $0x44] ss:$8 sps:$4 sm:$0xff]   ;;  %v1304_v55 = vld [vmem:[#allocation5 + $0x94] ss:$8 sps:$4 sm:$0xff]  }
  0x48   :  { %427 = vmatprep.subr.bf16.mxu0 %v1253_v16  ;;  %v1327_v56 = vld [vmem:[#allocation7 + $0x40] ss:$8 sps:$4 sm:$0xff]   ;;  %v1332_v57 = vld [vmem:[#allocation7 + $0x34] ss:$8 sps:$4 sm:$0xff]   ;;  %v1306_v58 = vld [vmem:[#allocation5 + $0x90] ss:$8 sps:$4 sm:$0xff]  }
  0x49   :  { %v1308_v59 = vld [vmem:[#allocation5 + $0x84] ss:$8 sps:$4 sm:$0xff]   ;;  %v1330_v60 = vld [vmem:[#allocation7 + $0x30] ss:$8 sps:$4 sm:$0xff]   ;;  %v1310_v62 = vld [vmem:[#allocation5 + $0x80] ss:$8 sps:$4 sm:$0xff]  }
  0x4a   :  { %479 = vmatpush1.bf16.msra.mxu1 %v1285_v25  ;;  %v1335_v61 = vld [vmem:[#allocation7 + $0x24] ss:$8 sps:$4 sm:$0xff]   ;;  %v1333_v63 = vld [vmem:[#allocation7 + $0x20] ss:$8 sps:$4 sm:$0xff]   ;;  %v1338_v1 = vld [vmem:[#allocation7 + $0x14] ss:$8 sps:$4 sm:$0xff]  }
  0x4b   :  { %428 = vmatpush1.bf16.msra.mxu0 %v1255_v19  ;;  %480 = vmatprep.subr.bf16.mxu1 %v1289_v26  ;;  %v1315_v2 = vld [vmem:[#allocation2 + $0x1c] ss:$12 sps:$4 sm:$0xff]   ;;  %v1339_v5 = vld [vmem:[#allocation7] ss:$8 sps:$4 sm:$0xff]   ;;  %v1344_v7 = vld [vmem:[#allocation7 + $0xf4] ss:$8 sps:$4 sm:$0xff]  }
  0x4c   :  { %429 = vmatprep.subr.bf16.mxu0 %v1256_v20  ;;  %v1336_v3 = vld [vmem:[#allocation7 + $0x10] ss:$8 sps:$4 sm:$0xff]   ;;  %v1341_v4 = vld [vmem:[#allocation7 + $0x4] ss:$8 sps:$4 sm:$0xff]   ;;  %v1317_v6 = vld [vmem:[#allocation2 + $0x18] ss:$12 sps:$4 sm:$0xff]  }
  0x4d   :  { %v1342_v8 = vld [vmem:[#allocation7 + $0xf0] ss:$8 sps:$4 sm:$0xff]   ;;  %v1347_v9 = vld [vmem:[#allocation7 + $0xe4] ss:$8 sps:$4 sm:$0xff]   ;;  %v1345_v10 = vld [vmem:[#allocation7 + $0xe0] ss:$8 sps:$4 sm:$0xff]  }
  0x4e   :  { %481 = vmatpush1.bf16.msra.mxu1 %v1291_v29  ;;  %v1348_v11 = vld [vmem:[#allocation7 + $0xd0] ss:$8 sps:$4 sm:$0xff]   ;;  %v1350_v12 = vld [vmem:[#allocation7 + $0xd4] ss:$8 sps:$4 sm:$0xff]   ;;  %v1353_v13 = vld [vmem:[#allocation7 + $0xc4] ss:$8 sps:$4 sm:$0xff]  }
  0x4f   :  { %430 = vmatpush1.bf16.msra.mxu0 %v1258_v23  ;;  %482 = vmatprep.subr.bf16.mxu1 %v1295_v30  ;;  %v1351_v14 = vld [vmem:[#allocation7 + $0xc0] ss:$8 sps:$4 sm:$0xff]   ;;  %v1356_v15 = vld [vmem:[#allocation7 + $0xb4] ss:$8 sps:$4 sm:$0xff]   ;;  %v1354_v16 = vld [vmem:[#allocation7 + $0xb0] ss:$8 sps:$4 sm:$0xff]  }
  0x50   :  { %431 = vmatprep.subr.bf16.mxu0 %v1262_v24  ;;  %v1359_v17 = vld [vmem:[#allocation7 + $0xa4] ss:$8 sps:$4 sm:$0xff]   ;;  %v1357_v18 = vld [vmem:[#allocation7 + $0xa0] ss:$8 sps:$4 sm:$0xff]   ;;  %v1362_v19 = vld [vmem:[#allocation7 + $0x94] ss:$8 sps:$4 sm:$0xff]  }
  0x51   :  { %v1360_v20 = vld [vmem:[#allocation7 + $0x90] ss:$8 sps:$4 sm:$0xff]   ;;  %v1365_v21 = vld [vmem:[#allocation7 + $0x84] ss:$8 sps:$4 sm:$0xff]   ;;  %v1363_v22 = vld [vmem:[#allocation7 + $0x80] ss:$8 sps:$4 sm:$0xff]  }
  0x52   :  { %483 = vmatpush1.bf16.msra.mxu1 %v1297_v33  ;;  %v1366_v23 = vld [vmem:[#allocation8 + $0x78] sm:$0xff]   ;;  %v1368_v25 = vld [vmem:[#allocation8 + $0x70] sm:$0xff]   ;;  %v1372_v29 = vld [vmem:[#allocation8 + $0x60] sm:$0xff]   ;;  %s1081_s19 = sshll.u32 %s1501_s18, 4  ;;  %s1082_s19 = int_to_ptr.vmem [resolvable:$true] %s1081_s19 }
  0x53   :  { %432 = vmatpush1.bf16.msra.mxu0 %v1264_v27  ;;  %484 = vmatprep.subr.bf16.mxu1 %v1301_v34  ;;  %v1367_v24 = vld [vmem:[#allocation8 + $0x38] sm:$0xff]   ;;  %v1369_v26 = vld [vmem:[#allocation8 + $0x30] sm:$0xff]   ;;  %v1370_v27 = vld [vmem:[#allocation8 + $0x68] sm:$0xff]   ;;  %p1467_p7 = scmp.lt.s32.totalorder %s1082_s19, %s1082_s19 }
  0x54   :  { %433 = vmatprep.subr.bf16.mxu0 %v1268_v28  ;;  %v1371_v28 = vld [vmem:[#allocation8 + $0x28] sm:$0xff]   ;;  %v1373_v30 = vld [vmem:[#allocation8 + $0x20] sm:$0xff]  }
  0x56   :  { %485 = vmatpush1.bf16.msra.mxu1 %v1303_v38 }
  0x57   :  { %434 = vmatpush2.bf16.msra.mxu0 %v1270_v31  ;;  %775 = vmatprep.subr.bf16.mxu1 %v1320_v39 }
  0x58   :  { %435 = vmatprep.subr.bf16.mxu0 %v1274_v32  ;;  %v525_v32 = vlaneseq }
  0x59   :  { %503 = vmatmul.mubr.bf16.vlgmr.msra.gmra.mxu1 %v1307_v42 }
  0x5a   :  { %512 = vmatprep.mubr.bf16.mxu1 %v1500_v0  ;;  %776 = vmatpush1.bf16.msra.mxu1 %v1318_v43  ;;  %v1311_v0 = vld [vmem:[#allocation2] ss:$12 sps:$4 sm:$0xff]   ;;  %v526_v34 = vshrl.u32 %v525_v32, 7 }
  0x5b   :  { %436 = vmatpush2.bf16.msra.mxu0 %v1276_v36  ;;  %777 = vmatprep.subr.bf16.mxu1 %v1323_v44  ;;  %v543_v43 = vld [vmem:[%s1608_s3] sm:$0x3] }
  0x5c   :  { %437 = vmatprep.subr.bf16.mxu0 %v1280_v37  ;;  %v1572_v36 = vsub.s32 0, %v526_v34  ;;  %v523_v37 = vld [vmem:[%s1607_s2] sm:$0x3]  ;;  %v1577_v38 = vsub.s32 1, %v526_v34 }
  0x5e   :  { %778 = vmatpush1.bf16.msra.mxu1 %v1321_v47  ;;  %v532_v44 = vrot.slane %v523_v37, %v1577_v38 }
  0x5f   :  { %438 = vmatpush2.bf16.msra.mxu0 %v1282_v40  ;;  %779 = vmatprep.subr.bf16.mxu1 %v1326_v48 }
  0x60   :  { %439 = vmatprep.subr.bf16.mxu0 %v1286_v41  ;;  %v528_v41 = vrot.slane %v523_v37, %v1572_v36 }
  0x61   :  { %513 = vmatmul.mubr.bf16.gmra.mxu1 %v1314_v51 }
  0x62   :  { %780 = vmatpush1.bf16.msra.mxu1 %v1324_v53 }
  0x63   :  { %440 = vmatpush2.bf16.msra.mxu0 %v1288_v45  ;;  %781 = vmatprep.subr.bf16.mxu1 %v1329_v54 }
  0x64   :  { %441 = vmatprep.subr.bf16.mxu0 %v1292_v46 }
  0x66   :  { %782 = vmatpush1.bf16.msra.mxu1 %v1327_v56 }
  0x67   :  { %442 = vmatpush2.bf16.msra.mxu0 %v1294_v49  ;;  %783 = vmatprep.subr.bf16.mxu1 %v1332_v57  ;;  %v548_v49 = vrot.slane %v543_v43, %v1572_v36 }
  0x68   :  { %443 = vmatprep.subr.bf16.mxu0 %v1298_v50  ;;  %v552_v50 = vrot.slane %v543_v43, %v1577_v38  ;;  %v1378_v43 = vld [vmem:[#allocation8 + $0x48] sm:$0xff]  }
  0x6a   :  { %784 = vmatpush1.bf16.msra.mxu1 %v1330_v60 }
  0x6b   :  { %444 = vmatpush2.bf16.msra.mxu0 %v1300_v52  ;;  %785 = vmatprep.subr.bf16.mxu1 %v1335_v61 }
  0x6c   :  { %445 = vmatprep.subr.bf16.mxu0 %v1304_v55 }
  0x6e   :  { %786 = vmatpush1.bf16.msra.mxu1 %v1333_v63 }
  0x6f   :  { %446 = vmatpush2.bf16.msra.mxu0 %v1306_v58  ;;  %787 = vmatprep.subr.bf16.mxu1 %v1338_v1 }
  0x70   :  { %447 = vmatprep.subr.bf16.mxu0 %v1308_v59 }
  0x72   :  { %788 = vmatpush1.bf16.msra.mxu1 %v1336_v3 }
  0x73   :  { %448 = vmatpush2.bf16.msra.mxu0 %v1310_v62  ;;  %789 = vmatprep.subr.bf16.mxu1 %v1341_v4 }
  0x74   :  { %1198 = vmatprep.subr.bf16.mxu0 %v1366_v23 }
  0x76   :  { %450 = vmatmul.mubr.bf16.vlgmr.msra.gmra.mxu0 %v1311_v0  ;;  %790 = vmatpush1.bf16.msra.mxu1 %v1339_v5 }
  0x77   :  { %459 = vmatprep.mubr.bf16.mxu0 %v1315_v2  ;;  %791 = vmatprep.subr.bf16.mxu1 %v1344_v7 }
  0x78   :  { %1199 = vmatpush3.bf16.msra.mxu0 %v1367_v24 }
  0x79   :  { %1200 = vmatprep.subr.bf16.mxu0 %v1368_v25 }
  0x7a   :  { %792 = vmatpush2.bf16.msra.mxu1 %v1342_v8 }
  0x7b   :  { %793 = vmatprep.subr.bf16.mxu1 %v1347_v9 }
  0x7c   :  { %1201 = vmatpush3.bf16.msra.mxu0 %v1369_v26 }
  0x7d   :  { %1202 = vmatprep.subr.bf16.mxu0 %v1370_v27 }
  0x7e   :  { %460 = vmatmul.mubr.bf16.gmra.mxu0 %v1317_v6  ;;  %794 = vmatpush2.bf16.msra.mxu1 %v1345_v10 }
  0x7f   :  { %795 = vmatprep.subr.bf16.mxu1 %v1350_v12 }
  0x80   :  { %1203 = vmatpush3.bf16.msra.mxu0 %v1371_v28 }
  0x81   :  { %1204 = vmatprep.subr.bf16.mxu0 %v1372_v29 }
  0x82   :  { %796 = vmatpush2.bf16.msra.mxu1 %v1348_v11 }
  0x83   :  { %797 = vmatprep.subr.bf16.mxu1 %v1353_v13 }
  0x84   :  { %1205 = vmatpush3.bf16.msra.mxu0 %v1373_v30 }
  0x86   :  { %798 = vmatpush2.bf16.msra.mxu1 %v1351_v14 }
  0x87   :  { %799 = vmatprep.subr.bf16.mxu1 %v1356_v15 }
  0x8a   :  { %800 = vmatpush2.bf16.msra.mxu1 %v1354_v16 }
  0x8b   :  { %801 = vmatprep.subr.bf16.mxu1 %v1359_v17 }
  0x8e   :  { %802 = vmatpush2.bf16.msra.mxu1 %v1357_v18 }
  0x8f   :  { %803 = vmatprep.subr.bf16.mxu1 %v1362_v19 }
  0x92   :  { %804 = vmatpush2.bf16.msra.mxu1 %v1360_v20 }
  0x93   :  { %805 = vmatprep.subr.bf16.mxu1 %v1365_v21 }
  0x96   :  { %806 = vmatpush2.bf16.msra.mxu1 %v1363_v22 }
 0x119   :  { %v504_v31 = vpop.f32.mrf.mxu1 }
 0x11b   :  { %v506_v33 = vpop.f32.mrf.mxu1 }
 0x11d   :  { %v508_v35 = vpop.f32.mrf.mxu1 }
 0x11f   :  { %v510_v39 = vpop.f32.mrf.mxu1 }
 0x121   :  { %v514_v46 = vpop.f32.mrf.mxu1 }
 0x123   :  { %v516_v54 = vpop.f32.mrf.mxu1 }
 0x125   :  { %v518_v63 = vpop.f32.mrf.mxu1 }
 0x127   :  { %v520_v12 = vpop.f32.mrf.mxu1 }
 0x136   :  { %v451_v40 = vpop.f32.mrf.mxu0 }
 0x137   :  { %v505_v42 = vadd.f32 %v504_v31, %v451_v40  ;;  %v1375_v40 = vld [vmem:[#allocation8 + $0x18] sm:$0xff]  }
 0x138   :  { %v453_v45 = vpop.f32.mrf.mxu0 }
 0x139   :  { %v507_v47 = vadd.f32 %v506_v33, %v453_v45  ;;  %v535_v48 = vmul.f32 %v528_v41, %v505_v42  ;;  %v1377_v42 = vld [vmem:[#allocation8 + $0x10] sm:$0xff]   ;;  %v1380_v45 = vld [vmem:[#allocation8 + $0x40] sm:$0xff]  }
 0x13a   :  { %v455_v51 = vpop.f32.mrf.mxu0 }
 0x13b   :  { %v536_v52 = vmul.f32 %v532_v44, %v507_v47  ;;  %v509_v53 = vadd.f32 %v508_v35, %v455_v51  ;;  %v555_v58 = vadd.f32 %v548_v49, %v535_v48  ;;  %v828_v47 = vld [vmem:[%s1610_s5] sm:$0x3] }
 0x13c   :  { %v457_v55 = vpop.f32.mrf.mxu0  ;;  %v833_v48 = vrot.slane %v828_v47, %v1572_v36 }
 0x13d   :  { %v537_v56 = vmul.f32 %v528_v41, %v509_v53  ;;  %v511_v57 = vadd.f32 %v510_v39, %v457_v55  ;;  %v556_v59 = vadd.f32 %v552_v50, %v536_v52  ;;  %v563_v5 = vmul.f32 0.2, %v555_v58  ;;  %v1374_v39 = vld [vmem:[#allocation8 + $0x58] sm:$0xff]  }
 0x13e   :  { %v461_v60 = vpop.f32.mrf.mxu0  ;;  %1206 = vmatprep.subr.bf16.mxu0 %v1374_v39 }
 0x13f   :  { %v557_v61 = vadd.f32 %v548_v49, %v537_v56  ;;  %v538_v62 = vmul.f32 %v532_v44, %v511_v57  ;;  %v515_v0 = vadd.f32 %v514_v46, %v461_v60  ;;  %v564_v6 = vmul.f32 0.2, %v556_v59  ;;  %1207 = vmatpush3.bf16.msra.mxu0 %v1375_v40  ;;  %v1381_v46 = vld [vmem:[#allocation8] sm:$0xff]  }
 0x140   :  { %v463_v1 = vpop.f32.mrf.mxu0  ;;  %v571_v20 = vmax.f32 %v555_v58, %v563_v5 }
 0x141   :  { %v565_v2 = vmul.f32 0.2, %v557_v61  ;;  %v558_v3 = vadd.f32 %v552_v50, %v538_v62  ;;  %v517_v4 = vadd.f32 %v516_v54, %v463_v1  ;;  %v539_v9 = vmul.f32 %v528_v41, %v515_v0 }
 0x142   :  { %v465_v7 = vpop.f32.mrf.mxu0  ;;  %v572_v18 = vmax.f32 %v556_v59, %v564_v6 }
 0x143   :  { %v566_v8 = vmul.f32 0.2, %v558_v3  ;;  %v540_v10 = vmul.f32 %v532_v44, %v517_v4  ;;  %v519_v11 = vadd.f32 %v518_v63, %v465_v7  ;;  %v573_v14 = vmax.f32 %v557_v61, %v565_v2 }
 0x144   :  { %v467_v13 = vpop.f32.mrf.mxu0  ;;  %v559_v21 = vadd.f32 %v548_v49, %v539_v9 }
 0x145   :  { %v560_v15 = vadd.f32 %v552_v50, %v540_v10  ;;  %v541_v16 = vmul.f32 %v528_v41, %v519_v11  ;;  %v521_v17 = vadd.f32 %v520_v12, %v467_v13  ;;  %v574_v19 = vmax.f32 %v558_v3, %v566_v8  ;;  %v1376_v41 = vld [vmem:[#allocation8 + $0x50] sm:$0xff]  }
 0x146   :  { %v579_v25 = vpack.c.bf16 %v573_v14, %v571_v20  ;;  %v567_v29 = vmul.f32 0.2, %v559_v21  ;;  %1208 = vmatprep.subr.bf16.mxu0 %v1376_v41 }
 0x147   :  { %v561_v22 = vadd.f32 %v548_v49, %v541_v16  ;;  %v542_v23 = vmul.f32 %v532_v44, %v521_v17  ;;  %v580_v24 = vpack.c.bf16 %v574_v19, %v572_v18  ;;  %v568_v26 = vmul.f32 0.2, %v560_v15  ;;  %1209 = vmatpush3.bf16.msra.mxu0 %v1377_v42  ;;  %v1379_v44 = vld [vmem:[#allocation8 + $0x8] sm:$0xff]   ;;  %v848_v49 = vld [vmem:[%s1611_s6] sm:$0x3] }
 0x148   :  { %v575_v35 = vmax.f32 %v559_v21, %v567_v29  ;;  %1210 = vmatprep.subr.bf16.mxu0 %v1378_v43  ;;  %v857_v52 = vrot.slane %v848_v49, %v1577_v38  ;;  %v853_v54 = vrot.slane %v848_v49, %v1572_v36 }
 0x149   :  { %v569_v27 = vmul.f32 0.2, %v561_v22  ;;  %v562_v28 = vadd.f32 %v552_v50, %v542_v23  ;;  %807 = vmatprep.mubr.bf16.mxu1 %v580_v24  ;;  %v576_v31 = vmax.f32 %v560_v15, %v568_v26  ;;  %v837_v50 = vrot.slane %v828_v47, %v1577_v38 }
 0x14a   :  { %808 = vmatmul.mubr.bf16.vlgmr.msra.gmra.mxu1 %v579_v25 }
 0x14b   :  { %v570_v30 = vmul.f32 0.2, %v562_v28  ;;  %v577_v33 = vmax.f32 %v561_v22, %v569_v27  ;;  %1211 = vmatpush3.bf16.msra.mxu0 %v1379_v44 }
 0x14c   :  { %1212 = vmatprep.subr.bf16.mxu0 %v1380_v45 }
 0x14d   :  { %v578_v32 = vmax.f32 %v562_v28, %v570_v30  ;;  %v581_v37 = vpack.c.bf16 %v577_v33, %v575_v35 }
 0x14f   :  { %v582_v34 = vpack.c.bf16 %v578_v32, %v576_v31  ;;  %1213 = vmatpush3.bf16.msra.mxu0 %v1381_v46  ;;  %v1181_v32 = vld [vmem:[%s1613_s8] ss:$0 sm:$0xff]  ;;  %s1462_s8 = scalar_lea.vmem %s1082_s19, 512 }
 0x150   :  { %p1463_p6 = scmp.ne.s32.totalorder %s1082_s19, %s1462_s8  ;;  %p1468_p8 = scmp.lt.s32.totalorder %s1462_s8, %s1462_s8 }
 0x151   :  { %817 = vmatprep.mubr.bf16.mxu1 %v582_v34 }
 0x152   :  { %818 = vmatmul.mubr.bf16.gmra.mxu1 %v581_v37  ;;  %p1469_p9 = por %p1468_p8, %p1467_p7 }
 0x154   :  { %p1470_p10 = pnand %p1469_p9, %p1463_p6 }
 0x20a   :  { %v809_v51 = vpop.f32.mrf.mxu1 }
 0x20b   :  { %v840_v53 = vmul.f32 %v833_v48, %v809_v51 }
 0x20c   :  { %v811_v55 = vpop.f32.mrf.mxu1 }
 0x20d   :  { %v841_v56 = vmul.f32 %v837_v50, %v811_v55  ;;  %v860_v60 = vadd.f32 %v853_v54, %v840_v53 }
 0x20e   :  { %v813_v57 = vpop.f32.mrf.mxu1 }
 0x20f   :  { %v861_v58 = vadd.f32 %v857_v52, %v841_v56  ;;  %v842_v59 = vmul.f32 %v833_v48, %v813_v57  ;;  %v868_v4 = vmul.f32 0.2, %v860_v60 }
 0x210   :  { %v815_v61 = vpop.f32.mrf.mxu1 }
 0x211   :  { %v862_v62 = vadd.f32 %v853_v54, %v842_v59  ;;  %v843_v63 = vmul.f32 %v837_v50, %v815_v61  ;;  %v869_v1 = vmul.f32 0.2, %v861_v58  ;;  %v876_v12 = vmax.f32 %v860_v60, %v868_v4 }
 0x212   :  { %v819_v0 = vpop.f32.mrf.mxu1 }
 0x213   :  { %v870_v2 = vmul.f32 0.2, %v862_v62  ;;  %v863_v3 = vadd.f32 %v857_v52, %v843_v63  ;;  %v844_v5 = vmul.f32 %v833_v48, %v819_v0  ;;  %v877_v9 = vmax.f32 %v861_v58, %v869_v1 }
 0x214   :  { %v821_v6 = vpop.f32.mrf.mxu1 }
 0x215   :  { %v871_v38 = vmul.f32 0.2, %v863_v3  ;;  %v845_v7 = vmul.f32 %v837_v50, %v821_v6  ;;  %v878_v8 = vmax.f32 %v862_v62, %v870_v2  ;;  %v864_v13 = vadd.f32 %v853_v54, %v844_v5 }
 0x216   :  { %v823_v36 = vpop.f32.mrf.mxu1 }
 0x217   :  { %v879_v10 = vmax.f32 %v863_v3, %v871_v38  ;;  %v865_v11 = vadd.f32 %v857_v52, %v845_v7  ;;  %v846_v14 = vmul.f32 %v833_v48, %v823_v36  ;;  %v884_v18 = vpack.c.bf16 %v878_v8, %v876_v12 }
 0x218   :  { %v825_v15 = vpop.f32.mrf.mxu1  ;;  %v872_v22 = vmul.f32 0.2, %v864_v13 }
 0x219   :  { %v847_v16 = vmul.f32 %v837_v50, %v825_v15  ;;  %v885_v17 = vpack.c.bf16 %v879_v10, %v877_v9  ;;  %v866_v19 = vadd.f32 %v853_v54, %v846_v14  ;;  %v873_v20 = vmul.f32 0.2, %v865_v11 }
 0x21a   :  { %v880_v28 = vmax.f32 %v864_v13, %v872_v22 }
 0x21b   :  { %v867_v21 = vadd.f32 %v857_v52, %v847_v16  ;;  %1055 = vmatprep.mubr.bf16.mxu0 %v885_v17  ;;  %v874_v23 = vmul.f32 0.2, %v866_v19  ;;  %v881_v26 = vmax.f32 %v865_v11, %v873_v20 }
 0x21c   :  { %1056 = vmatmul.mubr.bf16.vlgmr.msra.gmra.mxu0 %v884_v18 }
 0x21d   :  { %v875_v24 = vmul.f32 0.2, %v867_v21  ;;  %v882_v25 = vmax.f32 %v866_v19, %v874_v23 }
 0x21f   :  { %v883_v27 = vmax.f32 %v867_v21, %v875_v24  ;;  %v886_v30 = vpack.c.bf16 %v882_v25, %v880_v28 }
 0x221   :  { %v887_v29 = vpack.c.bf16 %v883_v27, %v881_v26 }
 0x223   :  { %1063 = vmatprep.mubr.bf16.mxu0 %v887_v29 }
 0x224   :  { %1064 = vmatmul.mubr.bf16.gmra.mxu0 %v886_v30 }
 0x2dc   :  { %v1214_v31 = vpop.f32.mrf.mxu0 }
 0x2de   :  { %v1215_v33 = vpop.f32.mrf.mxu0 }
 0x2df   :  { %v1216_v34 = vadd.f32 %v1215_v33, %v1214_v31 }
 0x2e0   :  { %v1217_v35 = vpop.f32.mrf.mxu0 }
 0x2e1   :  { %v1058_v37 = vadd.f32 %v1216_v34, %v1181_v32 }
 0x2e2   :  { %v1218_v39 = vpop.f32.mrf.mxu0 }
 0x2e3   :  { %1072 = vst [vmem:[#allocation10] sm:$0xff] %v1058_v37  ;;  %v1219_v40 = vadd.f32 %v1218_v39, %v1217_v35 }
 0x2e4   :  { %v1220_v41 = vpop.f32.mrf.mxu0 }
 0x2e5   :  { %v1061_v42 = vadd.f32 %v1219_v40, %v1181_v32 }
 0x2e6   :  { %v1221_v43 = vpop.f32.mrf.mxu0 }
 0x2e7   :  { %1073 = vst [vmem:[#allocation10 + $0x8] sm:$0xff] %v1061_v42  ;;  %v1222_v44 = vadd.f32 %v1221_v43, %v1220_v41 }
 0x2e8   :  { %v1223_v45 = vpop.f32.mrf.mxu0 }
 0x2e9   :  { %v1066_v46 = vadd.f32 %v1222_v44, %v1181_v32 }
 0x2ea   :  { %v1224_v47 = vpop.f32.mrf.mxu0 }
 0x2eb   :  { %1074 = vst [vmem:[#allocation10 + $0x10] sm:$0xff] %v1066_v46  ;;  %v1225_v48 = vadd.f32 %v1224_v47, %v1223_v45 }
 0x2ed   :  { %v1069_v49 = vadd.f32 %v1225_v48, %v1181_v32 }
 0x2ef   :  { %1075 = vst [vmem:[#allocation10 + $0x18] sm:$0xff] %v1069_v49 }
 0x2f0   :  { %1473 = shalt.err (!%p1470_p10)
}
 0x2f1   :  { %1087 = dma.vmem_to_hbm [thread:$0]  %s1082_s19, 512, %s1614_s9, [#allocation4], %s1491_s12, %s1491_s12, %s1492_s13  }
 0x2f2   :  { %1488 = dma.done.wait [#allocation4], 512  }
 0x2f3   :  { %1489 = vsyncadd [#allocation4], 4294966784 }
 0x2f4   :  { %1091 = vsyncpa [#allocation3], 1 }
 0x2f5   :  { %1092 = vsyncpa [#allocation6], 1 }
 0x2f6   :  { %1093 = vsyncpa [#allocation9], 1 }
 0x2f7   :  { %1094 = vsyncpa [#allocation4], 1 }

</bundles_post_ra>
